<compile_context>
chip_gen: v7x
topology: tpu7x:2x2x1
jax: 0.10.0
libtpu: 0.0.40
codegen_flags: <defaults>
</compile_context>

<pallas_src>
import jax
import jax.numpy as jnp
from jax.experimental import pallas as pl
from jax.experimental.pallas import tpu as pltpu


def bias_kernel(x_ref, b_ref, o_ref):
    # x_ref: (tile_n, F) tile of the input
    # b_ref: (1, F) bias, resident across the whole grid (constant block index)
    # o_ref: (tile_n, F) output tile
    o_ref[...] = x_ref[...] + b_ref[...]


def _round_up(v: int, m: int) -> int:
    return ((v + m - 1) // m) * m


def bias_add(
    x: jax.Array,
    bias: jax.Array,
    *,
    tile_n: int | None = None,
    max_block_bytes: int = 8 << 20,       # ~8 MiB blocks (review: v6e/v7x sweet spot)
    vmem_limit_bytes: int | None = None,   # if None, derived from the block size
    donate_x: bool = False,                # alias x -> output (x dead after this op)
) -> jax.Array:
    """input + bias with bias broadcast over the leading (batch) axis."""
    assert x.ndim == 2, "kernel expects (N, F) layout"
    N, F = x.shape
    assert bias.shape == (F,), "bias must match the feature dimension"

    itemsize = jnp.dtype(x.dtype).itemsize
    sublane = 16 if itemsize == 2 else 8  # bf16 packs 2 rows per sublane

    if tile_n is None:
        # Biggest batch-tile whose block fits the byte budget, rounded to the
        # sublane granularity. Full feature extent is kept in every block.
        rows = max_block_bytes // max(F * itemsize, 1)
        rows = max(sublane, (rows // sublane) * sublane)
        tile_n = min(N, rows)
        # Megacore: if everything fits in one block but the batch is big enough
        # to split at sublane granularity, force >=2 grid steps so both
        # TensorCores (v7x) get work under dimension_semantics=("parallel",).
        if tile_n >= N and N >= 2 * sublane:
            tile_n = _round_up(pl.cdiv(N, 2), sublane)
    if tile_n >= N:
        tile_n = N  # full-extent block: exempt from the (8, 128) divisibility rule

    grid = (pl.cdiv(N, tile_n),)

    # Give the bias a sublane axis and keep it in the input dtype (native-dtype add).
    bias2d = bias.reshape(1, F).astype(x.dtype)

    # Derive the scoped-VMEM budget from the actual (padded) block footprint:
    # auto-pipelining double-buffers both the input and output blocks.
    if vmem_limit_bytes is None:
        rows_pad = _round_up(tile_n, sublane)
        lanes_pad = _round_up(F, 128)
        block_bytes = rows_pad * lanes_pad * itemsize
        bias_bytes = sublane * lanes_pad * itemsize
        needed = 2 * 2 * block_bytes + 2 * bias_bytes + (1 << 20)  # +1 MiB slack
        # Floor at 16 MiB (cheap), cap at 56 MiB (headroom under v7x 64 MiB VMEM).
        vmem_limit_bytes = min(max(needed, 16 << 20), 56 << 20)

    cost = pl.CostEstimate(
        flops=N * F,
        transcendentals=0,
        bytes_accessed=2 * N * F * itemsize + F * itemsize,
    )

    return pl.pallas_call(
        bias_kernel,
        out_shape=jax.ShapeDtypeStruct((N, F), x.dtype),
        grid_spec=pl.GridSpec(
            grid=grid,
            in_specs=[
                pl.BlockSpec((tile_n, F), lambda i: (i, 0)),   # lane-dense x tile
                pl.BlockSpec((1, F), lambda i: (0, 0)),        # bias: resident in VMEM
            ],
            out_specs=pl.BlockSpec((tile_n, F), lambda i: (i, 0)),
        ),
        compiler_params=pltpu.CompilerParams(
            dimension_semantics=("parallel",),  # batch tiles are independent
            vmem_limit_bytes=vmem_limit_bytes,
        ),
        cost_estimate=cost,
        input_output_aliases=({0: 0} if donate_x else {}),
    )(x, bias2d)


if __name__ == "__main__":
    key = jax.random.PRNGKey(0)
    kx, kb, kx2, kx3 = jax.random.split(key, 4)

    # ---- Test 1: small batch, real dlshogi feature dim (2187, not a multiple
    # of 128) -> single full-extent block. ----
    N, F = 2, 9 * 9 * 27
    x = jax.random.normal(kx, (N, F), dtype=jnp.float32)
    bias = jax.random.normal(kb, (F,), dtype=jnp.float32)

    out = jax.block_until_ready(bias_add(x, bias))
    ref = x + bias
    assert out.shape == ref.shape and out.dtype == ref.dtype
    assert jnp.allclose(out, ref, atol=1e-6, rtol=1e-6)

    # nn.Parameter(torch.zeros(shape)) init -> identity
    out_zero = jax.block_until_ready(bias_add(x, jnp.zeros((F,), jnp.float32)))
    assert jnp.allclose(out_zero, x, atol=1e-6, rtol=1e-6)

    # ---- Test 2: larger batch with forced small tile -> multiple grid steps,
    # bias stays resident across them; derived vmem_limit path exercised. ----
    N2 = 32
    x2 = jax.random.normal(kx2, (N2, F), dtype=jnp.float32)
    out2 = jax.block_until_ready(bias_add(x2, bias, tile_n=8))
    assert jnp.allclose(out2, x2 + bias, atol=1e-6, rtol=1e-6)

    # Auto-tiled path (megacore split check: N2 >= 2*sublane -> >=2 grid steps).
    out2b = jax.block_until_ready(bias_add(x2, bias))
    assert jnp.allclose(out2b, x2 + bias, atol=1e-6, rtol=1e-6)

    # ---- Test 3: ragged batch (tile does not divide N) + bf16 native-dtype add. ----
    N3, F3 = 20, 256
    x3 = jax.random.normal(kx3, (N3, F3), dtype=jnp.bfloat16)
    b3 = jax.random.normal(kb, (F3,), dtype=jnp.bfloat16)
    out3 = jax.block_until_ready(bias_add(x3, b3, tile_n=16))
    assert out3.dtype == jnp.bfloat16
    assert jnp.allclose(out3.astype(jnp.float32),
                        (x3 + b3).astype(jnp.float32), atol=1e-2, rtol=1e-2)

    # ---- Test 4: donated input (input_output_aliases={0: 0}). ----
    x4 = jax.random.normal(kx, (N, F), dtype=jnp.float32)
    out4 = jax.block_until_ready(bias_add(x4, bias, donate_x=True))
    assert jnp.allclose(out4, x4 + bias, atol=1e-6, rtol=1e-6)

    print("KERNEL_OK")
</pallas_src>

<mosaic_0001>
module attributes {stable_mosaic.version = 11 : i64} {
  func.func @bias_kernel(%arg0: i32, %arg1: memref<2x2187xf32, #tpu.memory_space<vmem>>, %arg2: memref<1x2187xf32, #tpu.memory_space<vmem>>, %arg3: memref<2x2187xf32, #tpu.memory_space<vmem>>) attributes {dimension_semantics = [#tpu.dimension_semantics<parallel>], iteration_bounds = array<i64: 1>, scalar_prefetch = 0 : i64, scratch_operands = 0 : i64, tpu.core_type = #tpu.core_type<tc>, window_params = [{transform_indices = @transform_0, window_bounds = array<i64: 2, 2187>}, {pipeline_mode = #tpu.pipeline_mode<synchronous>, transform_indices = @transform_1, window_bounds = array<i64: 1, 2187>}, {transform_indices = @transform_2, window_bounds = array<i64: 2, 2187>}]} {
    %c0 = arith.constant 0 : index
    %c0_0 = arith.constant 0 : index
    %0 = vector.load %arg1[%c0, %c0_0] : memref<2x2187xf32, #tpu.memory_space<vmem>>, vector<2x2187xf32>
    %c0_1 = arith.constant 0 : index
    %c0_2 = arith.constant 0 : index
    %1 = vector.load %arg2[%c0_1, %c0_2] : memref<1x2187xf32, #tpu.memory_space<vmem>>, vector<1x2187xf32>
    %2 = vector.broadcast %1 : vector<1x2187xf32> to vector<2x2187xf32>
    %3 = arith.addf %0, %2 : vector<2x2187xf32>
    %c0_3 = arith.constant 0 : index
    %c0_4 = arith.constant 0 : index
    %4 = vector.load %arg3[%c0_3, %c0_4] : memref<2x2187xf32, #tpu.memory_space<vmem>>, vector<2x2187xf32>
    tpu.vector_store %arg3[%c0_3, %c0_4], %3 {strides = array<i32>} : memref<2x2187xf32, #tpu.memory_space<vmem>>, vector<2x2187xf32>,
    return
  }
  func.func @transform_0(%arg0: i32) -> (i32, i32) {
    %c0_i32 = arith.constant 0 : i32
    %c0_i32_0 = arith.constant 0 : i32
    return %arg0, %c0_i32 : i32, i32
  }
  func.func @transform_1(%arg0: i32) -> (i32, i32) {
    %c0_i32 = arith.constant 0 : i32
    %c0_i32_0 = arith.constant 0 : i32
    %c0_i32_1 = arith.constant 0 : i32
    return %c0_i32, %c0_i32_0 : i32, i32
  }
  func.func @transform_2(%arg0: i32) -> (i32, i32) {
    %c0_i32 = arith.constant 0 : i32
    %c0_i32_0 = arith.constant 0 : i32
    return %arg0, %c0_i32 : i32, i32
  }
}

</mosaic_0001>

<bundles_post_ra>
// kernel: tpu_custom_call.1
= control target key start
LH: loop header
LB: loop body
LE: loop exit
PB: predicated region body
PF: predicated region fallthrough
CT: control target
= control target key end

     0   :  { %7 = vsyncpa [#allocation3], 0  ;;  %s360_s0 = inlined_call_operand.hbm [shape: f32[2,2187], index: 0, kind: input, shape index: {}]   ;;  %s361_s1 = inlined_call_operand.hbm [shape: f32[1,2187], index: 1, kind: input, shape index: {}]   ;;  %s362_s2 = inlined_call_operand.hbm [shape: f32[2,2187], index: 2, kind: output, shape index: {}]  }
   0x1   :  { %8 = vsyncpa [#allocation6], 0 }
   0x2   :  { %9 = vsyncpa [#allocation4], 0  ;;  %s305_s9 = smov [#allocation2]   ;;  %s306_s11 = smov [#allocation5]  }
   0x3   :  { %s16_s10 = sshll.u32 %s305_s9, 4  ;;  %s26_s12 = sshll.u32 %s306_s11, 4  ;;  %s17_s10 = int_to_ptr.vmem [resolvable:$true] %s16_s10  ;;  %s27_s12 = int_to_ptr.vmem [resolvable:$true] %s26_s12 }
   0x4   :  { %s233_s15 = scalar_lea.hbm %s360_s0, 576 }
   0x5   :  { %p234_p0 = scmp.ne.s32.totalorder %s360_s0, %s233_s15  ;;  %p237_p1 = scmp.lt.u32.totalorder %s233_s15, %s360_s0 }
   0x7   :  { %p239_p2 = pnand %p237_p1, %p234_p0 }
   0x9   :  { %242 = shalt.err (!%p239_p2)
}
   0xa   :  { %s243_s20 = scalar_lea.vmem %s17_s10, 576  ;;  %p248_p4 = scmp.lt.s32.totalorder %s17_s10, %s17_s10 }
   0xb   :  { %p244_p3 = scmp.ne.s32.totalorder %s17_s10, %s243_s20  ;;  %p249_p5 = scmp.lt.s32.totalorder %s243_s20, %s243_s20 }
   0xd   :  { %p250_p6 = por %p249_p5, %p248_p4 }
   0xf   :  { %p251_p7 = pnand %p250_p6, %p244_p3 }
  0x11   :  { %254 = shalt.err (!%p251_p7)
}
  0x12   :  { %19 = dma.hbm_to_vmem [thread:$0]  %s360_s0, 576, %s17_s10, [#allocation3]  }
  0x13   :  { %s255_s25 = scalar_lea.hbm %s361_s1, 288 }
  0x14   :  { %p256_p8 = scmp.ne.s32.totalorder %s361_s1, %s255_s25  ;;  %p259_p9 = scmp.lt.u32.totalorder %s255_s25, %s361_s1 }
  0x16   :  { %p261_p10 = pnand %p259_p9, %p256_p8 }
  0x18   :  { %264 = shalt.err (!%p261_p10)
}
  0x19   :  { %s265_s30 = scalar_lea.vmem %s27_s12, 288  ;;  %p270_p12 = scmp.lt.s32.totalorder %s27_s12, %s27_s12 }
  0x1a   :  { %p266_p11 = scmp.ne.s32.totalorder %s27_s12, %s265_s30  ;;  %p271_p13 = scmp.lt.s32.totalorder %s265_s30, %s265_s30 }
  0x1c   :  { %p272_p0 = por %p271_p13, %p270_p12 }
  0x1e   :  { %p273_p1 = pnand %p272_p0, %p266_p11 }
  0x20   :  { %276 = shalt.err (!%p273_p1)
}
  0x21   :  { %29 = dma.hbm_to_vmem [thread:$0]  %s361_s1, 288, %s27_s12, [#allocation6]  }
  0x22   :  { %299 = dma.done.wait [#allocation3], 576  }
  0x23   :  { %300 = vsyncadd [#allocation3], 4294966720 }
  0x24   :  { %301 = dma.done.wait [#allocation6], 288  }
  0x25   :  { %302 = vsyncadd [#allocation6], 4294967008  ;;  %v47_v0 = vlaneseq  ;;  %v307_v1 = vmov 1983009808   ;;  %v41_v13 = vld [vmem:[#allocation5] sm:$0xff]  ;;  %v42_v19 = vld [vmem:[#allocation5 + $0x8] sm:$0xff] }
  0x26   :  { %v122_v2 = vunpack.c.l.s4 %v307_v1  ;;  %v43_v36 = vld [vmem:[#allocation5 + $0x10] sm:$0x3]  ;;  %v36_v37 = vld [vmem:[#allocation2] sm:$0xff]  ;;  %v37_v43 = vld [vmem:[#allocation2 + $0x8] sm:$0xff]  ;;  %vm209_vm0 = vcmask 1041408   ;;  %vm210_vm1 = vcmask 84994  }
  0x27   :  { %v48_v3 = vshrl.u32 %v47_v0, 7  ;;  %v38_v52 = vld [vmem:[#allocation2 + $0x10] sm:$0xff]  ;;  %v39_v61 = vld [vmem:[#allocation2 + $0x18] sm:$0xff]  ;;  %v40_v62 = vld [vmem:[#allocation2 + $0x20] sm:$0xf]  ;;  %s308_s1 = smov [#allocation7]  }
  0x28   :  { %v123_v4 = vunpack.c.0.s8 %v122_v2  ;;  %s219_s4 = sshll.u32 %s308_s1, 4  ;;  %vm211_vm2 = vmor %vm210_vm1, %vm209_vm0  ;;  %s220_s4 = int_to_ptr.vmem [resolvable:$true] %s219_s4 }
  0x29   :  { %v49_v5 = vsub.s32 0, %v48_v3  ;;  %v53_v6 = vsub.s32 1, %v48_v3  ;;  %v57_v7 = vsub.s32 2, %v48_v3  ;;  %v61_v8 = vsub.s32 3, %v48_v3  ;;  %s277_s5 = scalar_lea.vmem %s220_s4, 576  ;;  %p282_p3 = scmp.lt.s32.totalorder %s220_s4, %s220_s4 }
  0x2a   :  { %v65_v9 = vsub.s32 4, %v48_v3  ;;  %v69_v10 = vsub.s32 5, %v48_v3  ;;  %v73_v11 = vsub.s32 6, %v48_v3  ;;  %v77_v12 = vsub.s32 7, %v48_v3  ;;  %p278_p2 = scmp.ne.s32.totalorder %s220_s4, %s277_s5  ;;  %p283_p4 = scmp.lt.s32.totalorder %s277_s5, %s277_s5 }
  0x2b   :  { %v126_v14 = vsub.s32 %v123_v4, %v48_v3  ;;  %v50_v15 = vrot.slane %v41_v13, %v49_v5  ;;  %v54_v16 = vrot.slane %v41_v13, %v53_v6  ;;  %v58_v17 = vrot.slane %v41_v13, %v57_v7 }
  0x2c   :  { %v62_v18 = vrot.slane %v41_v13, %v61_v8  ;;  %v66_v20 = vrot.slane %v41_v13, %v65_v9  ;;  %v70_v21 = vrot.slane %v41_v13, %v69_v10  ;;  %v74_v22 = vrot.slane %v41_v13, %v73_v11  ;;  %p284_p5 = por %p283_p4, %p282_p3 }
  0x2d   :  { %v78_v23 = vrot.slane %v41_v13, %v77_v12  ;;  %v119_v24 = vcombine.low %v50_v15, %v54_v16  ;;  %v82_v26 = vrot.slane %v42_v19, %v49_v5  ;;  %v86_v27 = vrot.slane %v42_v19, %v53_v6 }
  0x2e   :  { %v120_v25 = vcombine.low %v58_v17, %v62_v18  ;;  %v136_v28 = vcombine.low %v66_v20, %v70_v21  ;;  %v90_v30 = vrot.slane %v42_v19, %v57_v7  ;;  %v94_v31 = vrot.slane %v42_v19, %v61_v8  ;;  %p285_p6 = pnand %p284_p5, %p278_p2 }
  0x2f   :  { %v137_v29 = vcombine.low %v74_v22, %v78_v23  ;;  %v127_v32 = vrot.slane %v119_v24, %v126_v14  ;;  %v153_v34 = vcombine.low %v82_v26, %v86_v27  ;;  %v98_v35 = vrot.slane %v42_v19, %v65_v9 }
  0x30   :  { %v134_v33 = vrot.slane %v120_v25, %v126_v14  ;;  %v144_v38 = vrot.slane %v136_v28, %v126_v14  ;;  %v154_v40 = vcombine.low %v90_v30, %v94_v31  ;;  %v102_v41 = vrot.slane %v42_v19, %v69_v10 }
  0x31   :  { %v151_v39 = vrot.slane %v137_v29, %v126_v14  ;;  %v161_v44 = vrot.slane %v153_v34, %v126_v14  ;;  %v106_v45 = vrot.slane %v42_v19, %v73_v11  ;;  %v110_v46 = vrot.slane %v42_v19, %v77_v12 }
  0x32   :  { %v135_v42 = vcombine.low %v127_v32, %v134_v33  ;;  %v168_v48 = vrot.slane %v154_v40, %v126_v14  ;;  %v170_v49 = vcombine.low %v98_v35, %v102_v41  ;;  %v114_v50 = vrot.slane %v43_v36, %v49_v5 }
  0x33   :  { %v152_v47 = vcombine.low %v144_v38, %v151_v39  ;;  %v171_v53 = vcombine.low %v106_v45, %v110_v46  ;;  %v118_v54 = vrot.slane %v43_v36, %v53_v6 }
  0x34   :  { %v200_v51 = vadd.f32 %v135_v42, %v36_v37  ;;  %v169_v56 = vcombine.low %v161_v44, %v168_v48  ;;  %v178_v57 = vrot.slane %v170_v49, %v126_v14 }
  0x35   :  { %v201_v55 = vadd.f32 %v152_v47, %v37_v43  ;;  %v185_v58 = vrot.slane %v171_v53, %v126_v14  ;;  %v187_v59 = vcombine.low %v114_v50, %v118_v54 }
  0x36   :  { %205 = vst [vmem:[#allocation7] sm:$0xff] %v200_v51  ;;  %v202_v60 = vadd.f32 %v169_v56, %v38_v52 }
  0x37   :  { %206 = vst [vmem:[#allocation7 + $0x8] sm:$0xff] %v201_v55  ;;  %v186_v63 = vcombine.low %v178_v57, %v185_v58  ;;  %v194_v0 = vrot.slane %v187_v59, %v126_v14 }
  0x38   :  { %207 = vst [vmem:[#allocation7 + $0x10] sm:$0xff] %v202_v60 }
  0x39   :  { %v203_v1 = vadd.f32 %v186_v63, %v39_v61  ;;  %v204_v2 = vadd.f32 %v194_v0, %v40_v62 }
  0x3b   :  { %208 = vst [vmem:[#allocation7 + $0x18] sm:$0xff] %v203_v1  ;;  %212 = vst.msk [vmem:[#allocation7 + $0x20] sm:$0xf] %vm211_vm2, %v204_v2 }
  0x3c   :  { %288 = shalt.err (!%p285_p6)
}
  0x3d   :  { %s289_s8 = scalar_lea.hbm %s362_s2, 576 }
  0x3e   :  { %p290_p7 = scmp.ne.s32.totalorder %s362_s2, %s289_s8  ;;  %p293_p8 = scmp.lt.u32.totalorder %s289_s8, %s362_s2 }
  0x40   :  { %p295_p9 = pnand %p293_p8, %p290_p7 }
  0x42   :  { %298 = shalt.err (!%p295_p9)
}
  0x43   :  { %222 = dma.vmem_to_hbm [thread:$0]  %s220_s4, 576, %s362_s2, [#allocation4]  }
  0x44   :  { %303 = dma.done.wait [#allocation4], 576  }
  0x45   :  { %304 = vsyncadd [#allocation4], 4294966720 }
  0x46   :  { %226 = vsyncpa [#allocation3], 1 }
  0x47   :  { %227 = vsyncpa [#allocation6], 1 }
  0x48   :  { %228 = vsyncpa [#allocation4], 1 }

</bundles_post_ra>
